<compile_context>
chip_gen: v7x
topology: tpu7x:2x2x1
jax: 0.10.0
libtpu: 0.0.40
codegen_flags: <defaults>
</compile_context>

<pallas_src>
import jax
import jax.numpy as jnp
from jax.experimental import pallas as pl
from jax.experimental.pallas import tpu as pltpu


def _pooler_kernel(x_ref, w_ref, b_ref, o_ref):
    """One output-column tile of tanh(x @ W.T + b).

    x_ref: (B, H)   first-token activations (resident across the grid)
    w_ref: (TN, H)  rows [j*TN, (j+1)*TN) of the nn.Linear weight (out, in)
    b_ref: (1, TN)  matching bias slice
    o_ref: (B, TN)  pooled-output tile
    """
    # NT contraction on the shared H axis; f32 accumulation on the MXU.
    # TODO(synk): verify via pl.lower_as_mlir that Mosaic uses the transposed
    # MXU operand feed here and does not materialize a per-step (TN, H)
    # transpose in VMEM; if it does, pre-transpose the weight to (H, TN).
    y = jax.lax.dot_general(
        x_ref[...], w_ref[...],
        dimension_numbers=(((1,), (1,)), ((), ())),
        preferred_element_type=jnp.float32,
    )
    y = y + b_ref[...].astype(jnp.float32)
    o_ref[...] = jnp.tanh(y).astype(o_ref.dtype)


def _pick_tile_n(hidden: int, w_itemsize: int) -> int:
    """Weight row-tile size: lane-dense (multiple of 128), divides H, gives
    >= 2 grid steps when possible, per-tile DMA in the ~2-8 MiB sweet spot."""
    candidates = [tn for tn in range(128, hidden, 128) if hidden % tn == 0]
    if not candidates:
        # hidden <= 128 or hidden not a multiple of 128: single full-extent tile
        # (guarded in the wrapper so it cannot silently blow VMEM).
        return hidden
    max_tile_bytes = 8 << 20
    fitting = [tn for tn in candidates if tn * hidden * w_itemsize <= max_tile_bytes]
    if fitting:
        return max(fitting)
    return min(candidates)


def _vmem_limit_bytes(batch, hidden, tn, x_item, w_item, o_item, n_w_buffers):
    """Scoped-VMEM limit sized from the real buffers (+headroom), v7x-safe cap."""
    w_buf = n_w_buffers * tn * hidden * w_item          # streamed weight tiles
    x_buf = 2 * batch * hidden * x_item                 # resident activations
    b_buf = n_w_buffers * tn * 4                        # bias tiles
    o_buf = 2 * batch * tn * o_item                     # output tiles
    need = w_buf + x_buf + b_buf + o_buf
    limit = int(need * 1.25) + (2 << 20)                # compiler temporaries
    return int(max(16 << 20, min(limit, 64 << 20)))     # 64 MiB = v7x physical VMEM


def roformer_pooler(hidden_states, weight, bias, *, stream_dtype=None):
    """tanh(hidden_states[:, 0] @ weight.T + bias)  (RoFormerPooler.forward).

    hidden_states: (B, S, H); weight: (H, H) [out_features, in_features]; bias: (H,).
    stream_dtype: optional dtype (e.g. jnp.bfloat16) to stream activations+weight
      in; halves the HBM-bound weight bytes, accumulation remains f32.
    """
    B, S, H = hidden_states.shape
    out_dtype = hidden_states.dtype

    # First-token slice in the wrapper: only B*H bytes of extra XLA work,
    # negligible vs the H^2 weight traffic, and it keeps the resident VMEM
    # activation block tiny.
    first = hidden_states[:, 0, :]
    if stream_dtype is not None:
        first = first.astype(stream_dtype)
        weight = weight.astype(stream_dtype)

    w_item = jnp.dtype(weight.dtype).itemsize
    x_item = jnp.dtype(first.dtype).itemsize
    o_item = jnp.dtype(out_dtype).itemsize

    tn = _pick_tile_n(H, w_item)
    if tn == H and H % 128 != 0 and H * H * w_item > (48 << 20):
        raise ValueError(
            "hidden_size is not a multiple of 128 and the full (H, H) weight "
            "does not fit VMEM as one block; pad hidden_size to a multiple of "
            "128 or stream the weight in bf16 (stream_dtype=jnp.bfloat16).")
    grid = (H // tn,)
    tile_bytes = tn * H * w_item

    # Small tiles + enough steps: a 3rd outstanding weight buffer keeps the DMA
    # engine saturated across step boundaries; large tiles keep the default 2.
    use_triple = grid[0] >= 3 and tile_bytes < (2 << 20)
    n_w_buffers = 3 if use_triple else 2
    if use_triple:
        w_spec = pl.BlockSpec((tn, H), lambda j: (j, 0),
                              pipeline_mode=pl.Buffered(3))
    else:
        w_spec = pl.BlockSpec((tn, H), lambda j: (j, 0))

    bias2 = bias.reshape(1, H)   # 2-D for TPU layout

    cost = pl.CostEstimate(
        flops=2 * B * H * H,
        transcendentals=B * H,
        bytes_accessed=(H * H * w_item + B * H * x_item
                        + H * jnp.dtype(bias2.dtype).itemsize + B * H * o_item),
    )

    return pl.pallas_call(
        _pooler_kernel,
        out_shape=jax.ShapeDtypeStruct((B, H), out_dtype),
        grid_spec=pltpu.PrefetchScalarGridSpec(
            num_scalar_prefetch=0,
            grid=grid,
            in_specs=[
                # first-token activations; same block every step (stays resident)
                pl.BlockSpec((B, H), lambda j: (0, 0)),
                # streamed, lane-dense weight row tiles (pipelined DMA)
                w_spec,
                # matching bias slice
                pl.BlockSpec((1, tn), lambda j: (0, j)),
            ],
            out_specs=pl.BlockSpec((B, tn), lambda j: (0, j)),
        ),
        compiler_params=pltpu.CompilerParams(
            # Output-column tiles are independent -> megacore-parallel on v7x.
            dimension_semantics=("parallel",),
            vmem_limit_bytes=_vmem_limit_bytes(
                B, H, tn, x_item, w_item, o_item, n_w_buffers),
        ),
        cost_estimate=cost,
    )(first, weight, bias2)


def reference_pooler(hidden_states, weight, bias):
    first = hidden_states[:, 0, :].astype(jnp.float32)
    y = jax.lax.dot_general(
        first, weight.astype(jnp.float32),
        dimension_numbers=(((1,), (1,)), ((), ())),
        precision=jax.lax.Precision.HIGHEST,
        preferred_element_type=jnp.float32,
    )
    y = y + bias.astype(jnp.float32)[None, :]
    return jnp.tanh(y).astype(hidden_states.dtype)


if __name__ == "__main__":
    key = jax.random.PRNGKey(0)
    k1, k2, k3, k4, k5, k6 = jax.random.split(key, 6)

    # --- small-shape check (single full-extent tile path) -------------------
    B, S, H = 2, 8, 32
    hs = jax.random.normal(k1, (B, S, H), dtype=jnp.float32)
    w = jax.random.normal(k2, (H, H), dtype=jnp.float32) * (1.0 / jnp.sqrt(H))
    b = jax.random.normal(k3, (H,), dtype=jnp.float32) * 0.01

    out = jax.block_until_ready(roformer_pooler(hs, w, b))
    ref = reference_pooler(hs, w, b)
    assert out.shape == (B, H)
    assert jnp.allclose(out, ref, atol=5e-3, rtol=5e-3), "small-shape mismatch"

    # --- tiled, lane-dense production path (grid > 1, H multiple of 128) ----
    B2, S2, H2 = 8, 16, 1024
    hs2 = jax.random.normal(k4, (B2, S2, H2), dtype=jnp.float32)
    w2 = jax.random.normal(k5, (H2, H2), dtype=jnp.float32) * (1.0 / jnp.sqrt(H2))
    b2 = jax.random.normal(k6, (H2,), dtype=jnp.float32) * 0.01

    out2 = jax.block_until_ready(roformer_pooler(hs2, w2, b2))
    ref2 = reference_pooler(hs2, w2, b2)
    assert out2.shape == (B2, H2)
    assert jnp.allclose(out2, ref2, atol=5e-3, rtol=5e-3), "tiled-path mismatch"

    # --- bf16-streamed weight (halves the dominant HBM traffic) -------------
    out_bf16 = jax.block_until_ready(
        roformer_pooler(hs2, w2, b2, stream_dtype=jnp.bfloat16))
    assert out_bf16.shape == (B2, H2)
    assert bool(jnp.all(jnp.isfinite(out_bf16)))
    assert jnp.allclose(out_bf16, ref2, atol=1e-1, rtol=1e-1), "bf16 path too far off"

    print("KERNEL_OK")
</pallas_src>

<mosaic_0001>
module attributes {stable_mosaic.version = 11 : i64} {
  func.func @_pooler_kernel(%arg0: i32, %arg1: memref<2x32xf32, #tpu.memory_space<vmem>>, %arg2: memref<32x32xf32, #tpu.memory_space<vmem>>, %arg3: memref<1x32xf32, #tpu.memory_space<vmem>>, %arg4: memref<2x32xf32, #tpu.memory_space<vmem>>) attributes {dimension_semantics = [#tpu.dimension_semantics<parallel>], iteration_bounds = array<i64: 1>, scalar_prefetch = 0 : i64, scratch_operands = 0 : i64, tpu.core_type = #tpu.core_type<tc>, window_params = [{pipeline_mode = #tpu.pipeline_mode<synchronous>, transform_indices = @transform_0, window_bounds = array<i64: 2, 32>}, {transform_indices = @transform_1, window_bounds = array<i64: 32, 32>}, {transform_indices = @transform_2, window_bounds = array<i64: 1, 32>}, {transform_indices = @transform_3, window_bounds = array<i64: 2, 32>}]} {
    %c0 = arith.constant 0 : index
    %c0_0 = arith.constant 0 : index
    %0 = vector.load %arg1[%c0, %c0_0] : memref<2x32xf32, #tpu.memory_space<vmem>>, vector<2x32xf32>
    %c0_1 = arith.constant 0 : index
    %c0_2 = arith.constant 0 : index
    %1 = vector.load %arg2[%c0_1, %c0_2] : memref<32x32xf32, #tpu.memory_space<vmem>>, vector<32x32xf32>
    %cst = arith.constant dense<0.000000e+00> : vector<2x32xf32>
    %2 = tpu.matmul %0, %1, %cst {dimension_numbers = #tpu.dot_dimension_numbers<[1], [1], [0], [0], [0, 0, 1, 0], [], []>} : vector<2x32xf32>, vector<32x32xf32>, vector<2x32xf32> -> vector<2x32xf32>
    %c0_3 = arith.constant 0 : index
    %c0_4 = arith.constant 0 : index
    %3 = vector.load %arg3[%c0_3, %c0_4] : memref<1x32xf32, #tpu.memory_space<vmem>>, vector<1x32xf32>
    %4 = vector.broadcast %3 : vector<1x32xf32> to vector<2x32xf32>
    %5 = arith.addf %2, %4 : vector<2x32xf32>
    %6 = math.tanh %5 : vector<2x32xf32>
    %c0_5 = arith.constant 0 : index
    %c0_6 = arith.constant 0 : index
    %7 = vector.load %arg4[%c0_5, %c0_6] : memref<2x32xf32, #tpu.memory_space<vmem>>, vector<2x32xf32>
    tpu.vector_store %arg4[%c0_5, %c0_6], %6 {strides = array<i32>} : memref<2x32xf32, #tpu.memory_space<vmem>>, vector<2x32xf32>,
    return
  }
  func.func @transform_0(%arg0: i32) -> (i32, i32) {
    %c0_i32 = arith.constant 0 : i32
    %c0_i32_0 = arith.constant 0 : i32
    %c0_i32_1 = arith.constant 0 : i32
    return %c0_i32, %c0_i32_0 : i32, i32
  }
  func.func @transform_1(%arg0: i32) -> (i32, i32) {
    %c0_i32 = arith.constant 0 : i32
    %c0_i32_0 = arith.constant 0 : i32
    return %arg0, %c0_i32 : i32, i32
  }
  func.func @transform_2(%arg0: i32) -> (i32, i32) {
    %c0_i32 = arith.constant 0 : i32
    %c0_i32_0 = arith.constant 0 : i32
    return %c0_i32, %arg0 : i32, i32
  }
  func.func @transform_3(%arg0: i32) -> (i32, i32) {
    %c0_i32 = arith.constant 0 : i32
    %c0_i32_0 = arith.constant 0 : i32
    return %c0_i32, %arg0 : i32, i32
  }
}

</mosaic_0001>

<bundles_post_ra>
// kernel: tpu_custom_call.1
= control target key start
LH: loop header
LB: loop body
LE: loop exit
PB: predicated region body
PF: predicated region fallthrough
CT: control target
= control target key end

     0   :  { %8 = vsyncpa [#allocation3], 0  ;;  %s344_s0 = inlined_call_operand.hbm [shape: f32[2,32], index: 0, kind: input, shape index: {}]   ;;  %s345_s1 = inlined_call_operand.hbm [shape: f32[32,32], index: 1, kind: input, shape index: {}]   ;;  %s346_s2 = inlined_call_operand.vmem [shape: f32[1,32], index: 2, kind: input, shape index: {}]   ;;  %s347_s3 = inlined_call_operand.hbm [shape: f32[2,32], index: 3, kind: output, shape index: {}]  }
   0x1   :  { %9 = vsyncpa [#allocation6], 0 }
   0x2   :  { %10 = vsyncpa [#allocation4], 0  ;;  %s270_s12 = smov [#allocation2]   ;;  %s271_s14 = smov [#allocation5]  }
   0x3   :  { %s17_s13 = sshll.u32 %s270_s12, 4  ;;  %s26_s15 = sshll.u32 %s271_s14, 4  ;;  %s18_s13 = int_to_ptr.vmem [resolvable:$true] %s17_s13  ;;  %s298_s15 = int_to_ptr.vmem [resolvable:$true] %s26_s15 }
   0x4   :  { %s198_s18 = scalar_lea.hbm %s344_s0, 32 }
   0x5   :  { %p199_p0 = scmp.ne.s32.totalorder %s344_s0, %s198_s18  ;;  %p202_p1 = scmp.lt.u32.totalorder %s198_s18, %s344_s0 }
   0x7   :  { %p204_p2 = pnand %p202_p1, %p199_p0 }
   0x9   :  { %207 = shalt.err (!%p204_p2)
}
   0xa   :  { %s208_s23 = scalar_lea.vmem %s18_s13, 32  ;;  %p213_p4 = scmp.lt.s32.totalorder %s18_s13, %s18_s13 }
   0xb   :  { %p209_p3 = scmp.ne.s32.totalorder %s18_s13, %s208_s23  ;;  %p214_p5 = scmp.lt.s32.totalorder %s208_s23, %s208_s23 }
   0xd   :  { %p215_p6 = por %p214_p5, %p213_p4 }
   0xf   :  { %p216_p7 = pnand %p215_p6, %p209_p3 }
  0x11   :  { %219 = shalt.err (!%p216_p7)
}
  0x12   :  { %20 = dma.hbm_to_vmem [thread:$0]  %s344_s0, 32, %s18_s13, [#allocation3]  }
  0x13   :  { %s220_s28 = scalar_lea.hbm %s345_s1, 512 }
  0x14   :  { %p221_p8 = scmp.ne.s32.totalorder %s345_s1, %s220_s28  ;;  %p224_p9 = scmp.lt.u32.totalorder %s220_s28, %s345_s1 }
  0x16   :  { %p226_p10 = pnand %p224_p9, %p221_p8 }
  0x18   :  { %229 = shalt.err (!%p226_p10)
}
  0x19   :  { %s230_s6 = scalar_lea.vmem %s298_s15, 512  ;;  %p235_p12 = scmp.lt.s32.totalorder %s298_s15, %s298_s15 }
  0x1a   :  { %p231_p11 = scmp.ne.s32.totalorder %s298_s15, %s230_s6  ;;  %p236_p13 = scmp.lt.s32.totalorder %s230_s6, %s230_s6 }
  0x1c   :  { %p237_p0 = por %p236_p13, %p235_p12 }
  0x1e   :  { %p238_p1 = pnand %p237_p0, %p231_p11 }
  0x20   :  { %241 = shalt.err (!%p238_p1)
}
  0x21   :  { %s272_s0 = smov 128   ;;  %s273_s7 = smov 8  }
  0x22   :  { %32 = dma.hbm_to_vmem [thread:$0]  %s345_s1, 512, %s298_s15, [#allocation6], %s272_s0, %s272_s0, %s273_s7  }
  0x23   :  { %264 = dma.done.wait [#allocation3], 32  }
  0x24   :  { %265 = vsyncadd [#allocation3], 4294967264 }
  0x25   :  { %266 = dma.done.wait [#allocation6], 512  }
  0x26   :  { %267 = vsyncadd [#allocation6], 4294966784  ;;  %v274_v0 = vmov 0.0|0.0   ;;  %vm275_vm0 = vmmov 0   ;;  %v276_v1 = vmov 0.0   ;;  %vm53_vm1 = vcmask 261120  }
  0x27   :  { %180 = vmatprep.subr.bf16.mxu0 %v274_v0  ;;  %177 = vmatprep.mubr.msk.f32.mxu0 %vm275_vm0, %v276_v1  ;;  %v42_v2 = vld [vmem:[#allocation5] sm:$0xff]  ;;  %v43_v3 = vld [vmem:[#allocation5 + $0x8] sm:$0xff]  ;;  %vm182_vm2 = vmpackc.low %vm53_vm1, %vm53_vm1  ;;  %s277_s11 = smov [#allocation7]   ;;  %vm140_vm3 = vcmask 254976  }
  0x28   :  { %v181_v4 = vpack.c.bf16 %v43_v3, %v42_v2  ;;  %v44_v5 = vld [vmem:[#allocation5 + $0x10] sm:$0xff]  ;;  %v45_v6 = vld [vmem:[#allocation5 + $0x18] sm:$0xff]  ;;  %s148_s12 = sshll.u32 %s277_s11, 4  ;;  %s149_s12 = int_to_ptr.vmem [resolvable:$true] %s148_s12 }
  0x29   :  { %v185_v7 = vpack.c.bf16 %v45_v6, %v44_v5  ;;  %v41_v8 = vld [vmem:[#allocation2] sm:$0x3]  ;;  %s242_s13 = scalar_lea.vmem %s149_s12, 32  ;;  %p247_p3 = scmp.lt.s32.totalorder %s149_s12, %s149_s12 }
  0x2a   :  { %183 = vmatpush3.bf16.xpose.msk.msra.mxu0 %vm182_vm2, %v181_v4  ;;  %v158_v9 = vld [vmem:[%s346_s2] ss:$0 sm:$0xff]  ;;  %p243_p2 = scmp.ne.s32.totalorder %s149_s12, %s242_s13  ;;  %p248_p4 = scmp.lt.s32.totalorder %s242_s13, %s242_s13 }
  0x2b   :  { %184 = vmatprep.subr.bf16.mxu0 %v274_v0 }
  0x2c   :  { %p249_p5 = por %p248_p4, %p247_p3 }
  0x2e   :  { %p250_p6 = pnand %p249_p5, %p243_p2 }
  0x32   :  { %187 = vmatpush3.bf16.xpose.msk.msra.mxu0 %vm182_vm2, %v185_v7 }
  0x39   :  { %178 = vmatmul.mubr.msk.f32.vlgmr.msra.gmra.mrb[0].mxu0 %vm53_vm1, %v41_v8 }
 0x10c   :  { %v135_v10 = vpop.f32.mrb[0].mxu0 }
 0x10d   :  { %v136_v11 = vadd.f32 %v158_v9, %v135_v10  ;;  %v179_v12 = vpop.f32.mrb[1].mxu0 }
 0x10f   :  { %196 = vtanh.f32 %v136_v11 }
 0x119   :  { %v197_v13 = vpop.eup %196 }
 0x11a   :  { %141 = vst.msk [vmem:[#allocation7] sm:$0x3] %vm140_vm3, %v197_v13 }
 0x11b   :  { %253 = shalt.err (!%p250_p6)
}
 0x11c   :  { %s254_s2 = scalar_lea.hbm %s347_s3, 32 }
 0x11d   :  { %p255_p7 = scmp.ne.s32.totalorder %s347_s3, %s254_s2  ;;  %p258_p8 = scmp.lt.u32.totalorder %s254_s2, %s347_s3 }
 0x11f   :  { %p260_p9 = pnand %p258_p8, %p255_p7 }
 0x121   :  { %263 = shalt.err (!%p260_p9)
}
 0x122   :  { %151 = dma.vmem_to_hbm [thread:$0]  %s149_s12, 32, %s347_s3, [#allocation4]  }
 0x123   :  { %268 = dma.done.wait [#allocation4], 32  }
 0x124   :  { %269 = vsyncadd [#allocation4], 4294967264 }
 0x125   :  { %155 = vsyncpa [#allocation3], 1 }
 0x126   :  { %156 = vsyncpa [#allocation6], 1 }
 0x127   :  { %157 = vsyncpa [#allocation4], 1 }

</bundles_post_ra>
